<compile_context>
chip_gen: v7x
topology: tpu7x:2x2x1
jax: 0.10.0
libtpu: 0.0.40
codegen_flags: <defaults>
</compile_context>

<pallas_src>
import functools
import math

import numpy as np
import jax
import jax.numpy as jnp
from jax.experimental import pallas as pl
from jax.experimental.pallas import tpu as pltpu

_LANE = 128
_SUBLANE = 8


# --------------------------------------------------------------------------
# Trace-time helpers (pure Python / NumPy)
# --------------------------------------------------------------------------
def _batcher_stages(group_size: int):
    """Batcher odd-even-mergesort comparator network for `group_size` elements.

    Returns a list of (distance, lo_positions, hi_positions).  All comparators
    in a stage share one distance, so each stage lowers to 2 XLU rolls +
    min/max + 2 selects over the tile.  Non-power-of-two sizes use the
    next-power-of-two network with out-of-range comparators dropped
    (equivalent to padding the group with +inf).  Stage count is O(log^2 g).
    """
    g = group_size
    m = 1
    while m < g:
        m *= 2
    stages = []
    p = 1
    while p < m:
        k = p
        while k >= 1:
            lo, hi = [], []
            j = k % p
            while j + k < m:
                for i in range(min(k, m - j - k)):
                    a, b = i + j, i + j + k
                    if (a // (2 * p)) == (b // (2 * p)) and b < g:
                        lo.append(a)
                        hi.append(b)
                j += 2 * k
            if lo:
                stages.append((k, lo, hi))
            k //= 2
        p *= 2
    return stages


def _build_stage_masks(stages, group_size, lane_real, lane_total):
    """(2 * n_stages, lane_total) int32 mask rows (lo at 2s, hi at 2s+1).

    Built at trace time with NumPy; pad lanes (>= lane_real) never participate,
    and group-boundary conditions are baked in, so the kernel does zero
    per-tile mask arithmetic.
    """
    lane = np.arange(lane_total)
    pos = lane % group_size
    real = lane < lane_real
    rows = []
    for _, lo, hi in stages:
        rows.append(real & np.isin(pos, np.asarray(lo, dtype=np.int64)))
        rows.append(real & np.isin(pos, np.asarray(hi, dtype=np.int64)))
    return jnp.asarray(np.stack(rows).astype(np.int32))


def _plan_layout(n_rows: int, c: int, lane_cap: int = 2048):
    """Choose (fold, row_pad, lane_pad) so the kernel sees (R, L) with L % 128 == 0.

    Prefers the SMALLEST 128-aligned fold that divides n_rows (max rows for the
    grid, no padding copy); falls back to a small row pad; if 128-alignment is
    unreachable by folding under `lane_cap`, pads the lane axis instead.
    """
    if c % _LANE == 0:
        return 1, 0, 0
    step = _LANE // math.gcd(c, _LANE)      # smallest fold with 128-aligned lanes
    max_fold = max(1, lane_cap // c)
    if step <= max_fold:
        for f in range(step, max_fold + 1, step):
            if n_rows % f == 0:
                return f, 0, 0               # lane-dense AND pad-free
        return step, (-n_rows) % step, 0     # lane-dense, small row pad
    # Alignment unreachable by folding: best exact row divisor, pad lanes to 128.
    f = 1
    for cand in range(max_fold, 0, -1):
        if n_rows % cand == 0:
            f = cand
            break
    return f, 0, (-(f * c)) % _LANE


# --------------------------------------------------------------------------
# Kernel
# --------------------------------------------------------------------------
def _groupsort_kernel(masks_ref, x_ref, o_ref, *, distances):
    """Sort contiguous groups along the lane axis with a Batcher network.

    masks_ref: (2*S, L) int32 grid-constant lo/hi masks (precomputed, hoisted).
    x_ref/o_ref: (TM, L) tiles, L a multiple of 128 -> every exchange is one
    pltpu.roll (XLU) and every store is lane-dense/unmasked.  Rows are fully
    independent (lane rolls never mix rows), so ragged last blocks are safe.
    """
    x = x_ref[...]                                   # (TM, L)
    lane_axis = x.ndim - 1
    L = x.shape[lane_axis]
    # Stage count is O(log^2 g) so full unrolling stays small; temporaries die
    # each stage since `x` is overwritten.
    # TODO(synk): for very large group_size, switch to lax.fori_loop over the
    # stage table (dynamic roll distance + dynamic mask row) to bound code size.
    for s, k in enumerate(distances):
        lo_m = masks_ref[pl.ds(2 * s, 1), :] != 0    # (1, L), broadcast over rows
        hi_m = masks_ref[pl.ds(2 * s + 1, 1), :] != 0
        x_fwd = pltpu.roll(x, L - k, axis=lane_axis)  # value at lane + k
        x_bwd = pltpu.roll(x, k, axis=lane_axis)      # value at lane - k
        x = jnp.where(lo_m, jnp.minimum(x, x_fwd),
                      jnp.where(hi_m, jnp.maximum(x, x_bwd), x))
    o_ref[...] = x


# --------------------------------------------------------------------------
# Wrapper
# --------------------------------------------------------------------------
def group_sort(x, num_units: int, axis: int = -1, *, lane_cap: int = 2048,
               tile_bytes: int = 2 * 1024 * 1024):
    """Pallas implementation of GroupSort.forward."""
    ndim = x.ndim
    axis = axis % ndim
    moved = axis != ndim - 1
    # TODO(synk): axis != -1 incurs two full HBM transposes (moveaxis in/out);
    # a sublane-axis in-kernel sort would remove that traffic. axis=-1 is the
    # fast path.
    x_t = jnp.moveaxis(x, axis, -1) if moved else x

    shape_t = x_t.shape
    C = shape_t[-1]
    if C % num_units:
        raise ValueError(
            f"number of features({C}) is not a multiple of num_units({num_units})"
        )
    group_size = C // num_units
    if group_size == 1 or x.size == 0:
        return x                                     # sorting groups of 1 is identity

    N = int(np.prod(shape_t[:-1])) if ndim > 1 else 1
    xf = x_t.reshape(N, C)

    # Lane-dense repack (group boundaries stay aligned: L_real is a multiple of C).
    fold, row_pad, lane_pad = _plan_layout(N, C, lane_cap)
    if row_pad:
        xf = jnp.pad(xf, ((0, row_pad), (0, 0)))
    L_real = fold * C
    R = (N + row_pad) // fold
    xr = xf.reshape(R, L_real)                       # pure reshape
    if lane_pad:
        xr = jnp.pad(xr, ((0, 0), (0, lane_pad)))    # pad lanes masked out of sort
    L = L_real + lane_pad

    # Trace-time sorting network + masks (no in-kernel mask construction).
    stages = _batcher_stages(group_size)
    distances = tuple(k for k, _, _ in stages)
    masks = _build_stage_masks(stages, group_size, L_real, L)
    n_mask_rows = int(masks.shape[0])

    # Row tile: ~tile_bytes, budgeted at >= 4 B/elem (v5e widens bf16 temps),
    # capped so the grid gets >= ~8 steps whenever enough rows exist
    # (pipelining + both v7x TensorCores), never collapsing to one giant block.
    eff_bytes = max(4, np.dtype(x.dtype).itemsize)
    tm = max(_SUBLANE, min(4096, tile_bytes // max(1, L * eff_bytes)))
    tm -= tm % _SUBLANE
    cap = -(-R // 8)                                  # cdiv(R, 8)
    cap = max(_SUBLANE, ((cap + _SUBLANE - 1) // _SUBLANE) * _SUBLANE)
    tm = min(tm, cap)
    if R < tm:                                        # tiny inputs only (R < 8)
        tm = R

    out = pl.pallas_call(
        functools.partial(_groupsort_kernel, distances=distances),
        out_shape=jax.ShapeDtypeStruct((R, L), x.dtype),
        grid=(pl.cdiv(R, tm),),                       # ragged last block handled by Pallas
        in_specs=[
            pl.BlockSpec((n_mask_rows, L), lambda i: (0, 0)),   # grid-constant masks
            pl.BlockSpec((tm, L), lambda i: (i, 0)),
        ],
        out_specs=pl.BlockSpec((tm, L), lambda i: (i, 0)),
        compiler_params=pltpu.CompilerParams(
            dimension_semantics=("parallel",),        # megacore sharding on v7x
            vmem_limit_bytes=48 * 1024 * 1024,        # lifts v5e's 16 MiB default,
        ),                                            # stays under v7x's 64 MiB physical
    )(masks, xr)

    out = out[:, :L_real].reshape(N + row_pad, C)[:N].reshape(shape_t)
    if moved:
        out = jnp.moveaxis(out, -1, axis)
    return out


class GroupSort:
    """Mirror of the PyTorch module (no learnable parameters)."""

    def __init__(self, num_units: int, axis: int = -1):
        self.num_units = num_units
        self.axis = axis

    def __call__(self, x):
        return group_sort(x, self.num_units, self.axis)


# --------------------------------------------------------------------------
# Reference + checks (host side)
# --------------------------------------------------------------------------
def _reference_group_sort(x, num_units, axis=-1):
    axis = axis % x.ndim
    x_t = jnp.moveaxis(x, axis, -1)
    C = x_t.shape[-1]
    g = C // num_units
    xg = x_t.reshape(*x_t.shape[:-1], num_units, g)
    xs = jnp.sort(xg, axis=-1)
    return jnp.moveaxis(xs.reshape(x_t.shape), -1, axis)


def _check_group_sorted(x, num_units, axis=-1):
    x_np = np.asarray(x).astype(np.float32)
    axis = axis % x_np.ndim
    x_t = np.moveaxis(x_np, axis, -1)
    C = x_t.shape[-1]
    g = C // num_units
    xg = x_t.reshape(*x_t.shape[:-1], num_units, g)
    return int(np.sum(np.diff(xg, axis=-1) < 0) == 0)


if __name__ == "__main__":
    def _assert_same(y, y_ref):
        np.testing.assert_allclose(np.asarray(y).astype(np.float32),
                                   np.asarray(y_ref).astype(np.float32),
                                   rtol=0, atol=0)

    # 1) NCHW-like input, axis=-1, 4 groups over last dim (C=16, g=4).
    x = jax.random.normal(jax.random.PRNGKey(0), (2, 4, 16, 16), dtype=jnp.float32)
    module = GroupSort(num_units=4, axis=-1)
    y = jax.block_until_ready(module(x))
    _assert_same(y, _reference_group_sort(x, 4, axis=-1))
    assert _check_group_sorted(y, 4, axis=-1) == 1, "GroupSort failed."

    # 2) Non-last sort axis (moveaxis path) with g=2 single-stage network.
    x2 = jax.random.normal(jax.random.PRNGKey(1), (2, 8, 4, 4), dtype=jnp.float32)
    y2 = jax.block_until_ready(group_sort(x2, num_units=4, axis=1))
    _assert_same(y2, _reference_group_sort(x2, 4, axis=1))
    assert _check_group_sorted(y2, 4, axis=1) == 1, "GroupSort failed."

    # 3) Non-power-of-two group size (C=12, g=6) exercising dropped comparators.
    x3 = jax.random.normal(jax.random.PRNGKey(2), (4, 16, 12), dtype=jnp.float32)
    y3 = jax.block_until_ready(group_sort(x3, num_units=2, axis=-1))
    _assert_same(y3, _reference_group_sort(x3, 2, axis=-1))
    assert _check_group_sorted(y3, 2, axis=-1) == 1, "GroupSort failed."

    # 4) bf16 path (C=32, g=4).
    x4 = jax.random.normal(jax.random.PRNGKey(3), (2, 64, 32), dtype=jnp.bfloat16)
    y4 = jax.block_until_ready(group_sort(x4, num_units=8, axis=-1))
    _assert_same(y4, _reference_group_sort(x4, 8, axis=-1))
    assert _check_group_sorted(y4, 8, axis=-1) == 1, "GroupSort failed."

    print("KERNEL_OK")
</pallas_src>

<mosaic_0001>
module attributes {stable_mosaic.version = 11 : i64} {
  func.func @_groupsort_kernel(%arg0: i32, %arg1: memref<6x128xi32, #tpu.memory_space<vmem>>, %arg2: memref<8x128xf32, #tpu.memory_space<vmem>>, %arg3: memref<8x128xf32, #tpu.memory_space<vmem>>) attributes {dimension_semantics = [#tpu.dimension_semantics<parallel>], iteration_bounds = array<i64: 2>, scalar_prefetch = 0 : i64, scratch_operands = 0 : i64, tpu.core_type = #tpu.core_type<tc>, window_params = [{pipeline_mode = #tpu.pipeline_mode<synchronous>, transform_indices = @transform_0, window_bounds = array<i64: 6, 128>}, {transform_indices = @transform_1, window_bounds = array<i64: 8, 128>}, {transform_indices = @transform_2, window_bounds = array<i64: 8, 128>}]} {
    %c0 = arith.constant 0 : index
    %c0_0 = arith.constant 0 : index
    %0 = vector.load %arg2[%c0, %c0_0] : memref<8x128xf32, #tpu.memory_space<vmem>>, vector<8x128xf32>
    %c0_1 = arith.constant 0 : index
    %c0_2 = arith.constant 0 : index
    %1 = vector.load %arg1[%c0_1, %c0_2] : memref<6x128xi32, #tpu.memory_space<vmem>>, vector<1x128xi32>
    %c0_i32 = arith.constant 0 : i32
    %2 = vector.broadcast %c0_i32 : i32 to vector<1x128xi32>
    %3 = arith.cmpi ne, %1, %2 : vector<1x128xi32>
    %c1 = arith.constant 1 : index
    %c0_3 = arith.constant 0 : index
    %4 = vector.load %arg1[%c1, %c0_3] : memref<6x128xi32, #tpu.memory_space<vmem>>, vector<1x128xi32>
    %c0_i32_4 = arith.constant 0 : i32
    %5 = vector.broadcast %c0_i32_4 : i32 to vector<1x128xi32>
    %6 = arith.cmpi ne, %4, %5 : vector<1x128xi32>
    %c127_i32 = arith.constant 127 : i32
    %7 = tpu.dynamic_rotate %0 by %c127_i32 dim 1 : vector<8x128xf32>, i32 -> vector<8x128xf32>
    %c1_i32 = arith.constant 1 : i32
    %8 = tpu.dynamic_rotate %0 by %c1_i32 dim 1 : vector<8x128xf32>, i32 -> vector<8x128xf32>
    %9 = arith.minimumf %0, %7 : vector<8x128xf32>
    %10 = arith.maximumf %0, %8 : vector<8x128xf32>
    %11 = vector.shape_cast %6 : vector<1x128xi1> to vector<1x128xi1>
    %12 = vector.broadcast %11 : vector<1x128xi1> to vector<8x128xi1>
    %13 = arith.select %12, %10, %0 : vector<8x128xi1>, vector<8x128xf32>
    %14 = vector.shape_cast %3 : vector<1x128xi1> to vector<1x128xi1>
    %15 = vector.broadcast %14 : vector<1x128xi1> to vector<8x128xi1>
    %16 = arith.select %15, %9, %13 : vector<8x128xi1>, vector<8x128xf32>
    %c2 = arith.constant 2 : index
    %c0_5 = arith.constant 0 : index
    %17 = vector.load %arg1[%c2, %c0_5] : memref<6x128xi32, #tpu.memory_space<vmem>>, vector<1x128xi32>
    %c0_i32_6 = arith.constant 0 : i32
    %18 = vector.broadcast %c0_i32_6 : i32 to vector<1x128xi32>
    %19 = arith.cmpi ne, %17, %18 : vector<1x128xi32>
    %c3 = arith.constant 3 : index
    %c0_7 = arith.constant 0 : index
    %20 = vector.load %arg1[%c3, %c0_7] : memref<6x128xi32, #tpu.memory_space<vmem>>, vector<1x128xi32>
    %c0_i32_8 = arith.constant 0 : i32
    %21 = vector.broadcast %c0_i32_8 : i32 to vector<1x128xi32>
    %22 = arith.cmpi ne, %20, %21 : vector<1x128xi32>
    %c126_i32 = arith.constant 126 : i32
    %23 = tpu.dynamic_rotate %16 by %c126_i32 dim 1 : vector<8x128xf32>, i32 -> vector<8x128xf32>
    %c2_i32 = arith.constant 2 : i32
    %24 = tpu.dynamic_rotate %16 by %c2_i32 dim 1 : vector<8x128xf32>, i32 -> vector<8x128xf32>
    %25 = arith.minimumf %16, %23 : vector<8x128xf32>
    %26 = arith.maximumf %16, %24 : vector<8x128xf32>
    %27 = vector.shape_cast %22 : vector<1x128xi1> to vector<1x128xi1>
    %28 = vector.broadcast %27 : vector<1x128xi1> to vector<8x128xi1>
    %29 = arith.select %28, %26, %16 : vector<8x128xi1>, vector<8x128xf32>
    %30 = vector.shape_cast %19 : vector<1x128xi1> to vector<1x128xi1>
    %31 = vector.broadcast %30 : vector<1x128xi1> to vector<8x128xi1>
    %32 = arith.select %31, %25, %29 : vector<8x128xi1>, vector<8x128xf32>
    %c4 = arith.constant 4 : index
    %c0_9 = arith.constant 0 : index
    %33 = vector.load %arg1[%c4, %c0_9] : memref<6x128xi32, #tpu.memory_space<vmem>>, vector<1x128xi32>
    %c0_i32_10 = arith.constant 0 : i32
    %34 = vector.broadcast %c0_i32_10 : i32 to vector<1x128xi32>
    %35 = arith.cmpi ne, %33, %34 : vector<1x128xi32>
    %c5 = arith.constant 5 : index
    %c0_11 = arith.constant 0 : index
    %36 = vector.load %arg1[%c5, %c0_11] : memref<6x128xi32, #tpu.memory_space<vmem>>, vector<1x128xi32>
    %c0_i32_12 = arith.constant 0 : i32
    %37 = vector.broadcast %c0_i32_12 : i32 to vector<1x128xi32>
    %38 = arith.cmpi ne, %36, %37 : vector<1x128xi32>
    %c127_i32_13 = arith.constant 127 : i32
    %39 = tpu.dynamic_rotate %32 by %c127_i32_13 dim 1 : vector<8x128xf32>, i32 -> vector<8x128xf32>
    %c1_i32_14 = arith.constant 1 : i32
    %40 = tpu.dynamic_rotate %32 by %c1_i32_14 dim 1 : vector<8x128xf32>, i32 -> vector<8x128xf32>
    %41 = arith.minimumf %32, %39 : vector<8x128xf32>
    %42 = arith.maximumf %32, %40 : vector<8x128xf32>
    %43 = vector.shape_cast %38 : vector<1x128xi1> to vector<1x128xi1>
    %44 = vector.broadcast %43 : vector<1x128xi1> to vector<8x128xi1>
    %45 = arith.select %44, %42, %32 : vector<8x128xi1>, vector<8x128xf32>
    %46 = vector.shape_cast %35 : vector<1x128xi1> to vector<1x128xi1>
    %47 = vector.broadcast %46 : vector<1x128xi1> to vector<8x128xi1>
    %48 = arith.select %47, %41, %45 : vector<8x128xi1>, vector<8x128xf32>
    %c0_15 = arith.constant 0 : index
    %c0_16 = arith.constant 0 : index
    %49 = vector.load %arg3[%c0_15, %c0_16] : memref<8x128xf32, #tpu.memory_space<vmem>>, vector<8x128xf32>
    tpu.vector_store %arg3[%c0_15, %c0_16], %48 {strides = array<i32>} : memref<8x128xf32, #tpu.memory_space<vmem>>, vector<8x128xf32>,
    return
  }
  func.func @transform_0(%arg0: i32) -> (i32, i32) {
    %c0_i32 = arith.constant 0 : i32
    %c0_i32_0 = arith.constant 0 : i32
    %c0_i32_1 = arith.constant 0 : i32
    return %c0_i32, %c0_i32_0 : i32, i32
  }
  func.func @transform_1(%arg0: i32) -> (i32, i32) {
    %c0_i32 = arith.constant 0 : i32
    %c0_i32_0 = arith.constant 0 : i32
    return %arg0, %c0_i32 : i32, i32
  }
  func.func @transform_2(%arg0: i32) -> (i32, i32) {
    %c0_i32 = arith.constant 0 : i32
    %c0_i32_0 = arith.constant 0 : i32
    return %arg0, %c0_i32 : i32, i32
  }
}

</mosaic_0001>

<bundles_post_ra>
// kernel: tpu_custom_call.1
= control target key start
LH: loop header
LB: loop body
LE: loop exit
PB: predicated region body
PF: predicated region fallthrough
CT: control target
= control target key end

     0   :  { %7 = vsyncpa [#allocation3], 0  ;;  %s780_s0 = inlined_call_operand.hbm [shape: s32[6,128], index: 0, kind: input, shape index: {}]   ;;  %s781_s1 = inlined_call_operand.hbm [shape: f32[16,128], index: 1, kind: input, shape index: {}]   ;;  %s782_s2 = inlined_call_operand.hbm [shape: f32[16,128], index: 2, kind: output, shape index: {}]  }
   0x1   :  { %8 = vsyncpa [#allocation6], 0 }
   0x2   :  { %10 = vsyncpa [#allocation6 + $0x1], 0 }
   0x3   :  { %11 = vsyncpa [#allocation4], 0 }
   0x4   :  { %13 = vsyncpa [#allocation4 + $0x1], 0  ;;  %s571_s9 = smov 0   ;;  %s573_s10 = smov 0  }
   0x5   :  { %s575_s11 = smov 0   ;;  %s577_s12 = smov 0  }
   0x6 LB: > { %s592_s13 = sadd.s32 4294967295, %s546_s12   ;;  %s342_s14 = sadd.s32 4294967294, %s546_s12   ;;  %s546_s12 = sphi %s577_s12, %s806_s12   ;;  %s542_s11 = sphi %s575_s11, %s805_s11   ;;  %s538_s10 = sphi %s573_s10, %s804_s10   ;;  %s534_s9 = sphi %s571_s9, %s803_s9  }
   0x7   : > { %p60_p0 = scmp.ne.s32.totalorder %s538_s10, %s534_s9  ;;  %p783_p1 = scmp.eq.s32.totalorder %s592_s13, 0 }
   0x8   : > { %p90_p3 = scmp.eq.s32.totalorder %s342_s14, 1  ;;  %p343_p5 = scmp.ge.s32.totalorder %s546_s12, 1 }
   0x9   : > { %p601_p4 = por %p783_p1, %p60_p0  ;;  %p97_p7 = scmp.lt.s32.totalorder %s546_s12, 3 }
   0xa   : > { %p606_p6 = por %p90_p3, %p60_p0  ;;  %s548_s18 = smov [#allocation2]  }
   0xb   : > { %s786_s15 = scalar_select %p601_p4, 1, 0 }
   0xc   : > { %s787_s16 = scalar_select %p606_p6, 1, 0 }
   0xd   : > { %p611_p8 = pnand %p343_p5, %p97_p7  ;;  %s110_s19 = sshll.u32 %s548_s18, 4  ;;  %s111_s19 = int_to_ptr.vmem [resolvable:$true] %s110_s19 }
   0xe   : > { %s619_s20 = sadd.s32 1, %s546_s12   ;;  %s47_s24 = sadd.s32 1, %s542_s11 }
   0xf   : > { %s788_s17 = scalar_select %p611_p8, 1, 0 }
  0x10   : > { %p364_p10 = pneg %p611_p8  ;;  %s44_s22 = ssub.s32 %s546_s12, %s619_s20 }
  0x11   : > { %p629_p12 = scmp.eq.s32.totalorder %s44_s22, 0  ;;  %s418_s27 = scalar_lea.hbm %s780_s0, 128 }
  0x12   : > { %p623_p11 = pnand %p364_p10, %p783_p1  ;;  %p419_p0 = scmp.ne.s32.totalorder %s780_s0, %s418_s27 }
  0x13   : > { %s790_s23 = scalar_select %p629_p12, 1, 0 }
  0x14   : > { %p420_p3 = pneg %p623_p11  ;;  %p425_p10 = scmp.lt.u32.totalorder %s418_s27, %s780_s0 }
  0x16   : > { %p421_p5 = pnand %p420_p3, %p419_p0 }
  0x18   : > { %p422_p7 = pneg %p421_p5 }
  0x1a   : > { %p427_p9 = pnand %p425_p10, %p422_p7 }
  0x1c   : > { %430 = shalt.err (!%p427_p9)
}
  0x1d   : > { %s431_s4 = scalar_lea.vmem %s111_s19, 128  ;;  %p439_p6 = scmp.lt.s32.totalorder %s111_s19, %s111_s19 }
  0x1e   : > { %p432_p1 = scmp.ne.s32.totalorder %s111_s19, %s431_s4  ;;  %p440_p4 = scmp.lt.s32.totalorder %s431_s4, %s431_s4 }
  0x20   : > { %p434_p2 = pnand %p432_p1, %p420_p3  ;;  %p441_p8 = por %p440_p4, %p439_p6 }
  0x22   : > { %p435_p13 = pneg %p434_p2 }
  0x24   : > { %p442_p12 = pnand %p441_p8, %p435_p13 }
  0x26   : > { %445 = shalt.err (!%p442_p12)
}
  0x27   : > { %367 = dma.hbm_to_vmem [thread:$0]  (!%p623_p11), %s780_s0, 128, %s111_s19, [#allocation3]  }
  0x28   : > { %p791_p1 = scmp.ne.s32.totalorder %s790_s23, 0  ;;  %p55_p2 = scmp.eq.s32.totalorder %s546_s12, 0 }
  0x29   : > { %p792_p4 = scmp.ne.s32.totalorder %s542_s11, %s538_s10  ;;  %p793_p6 = scmp.eq.s32.totalorder %s592_s13, 1 }
  0x2a   : > { %s655_s7 = scalar_select %p791_p1, %s542_s11, %s47_s24  }
  0x2b   : > { %p663_p8 = por %p793_p6, %p792_p4  ;;  %p377_p9 = scmp.lt.s32.totalorder %s546_s12, 2 }
  0x2c   : > { %s121_s14 = sand.u32 1, %s542_s11   ;;  %p795_p12 = pmov %p792_p4 }
  0x2d   : > { %s346_s18 = sshll.u32 %s121_s14, 3  ;;  %s347_s21 = sshll.u32 %s546_s12, 7 }
  0x2e   : > { %p56_p13 = por %p55_p2, %p795_p12  ;;  %s676_s19 = scalar_lea.hbm %s781_s1, %s347_s21 }
  0x2f   : > { %s125_s23 = scalar_lea.vmem [#allocation5], %s346_s18  ;;  %s122_s27 = scalar_lea.sflag [#allocation6], %s121_s14 }
  0x30   : > { %s132_s24 = sshll.u32 %s125_s23, 4  ;;  %p678_p11 = pnand %p377_p9, %p56_p13  ;;  %s682_s24 = int_to_ptr.vmem [resolvable:$true] %s132_s24 }
  0x31   : > { %s446_s28 = scalar_lea.hbm %s676_s19, 128  ;;  %s451_s3 = scalar_lea.hbm %s781_s1, 256 }
  0x32   : > { %p447_p0 = scmp.ne.s32.totalorder %s676_s19, %s446_s28  ;;  %p448_p3 = pneg %p678_p11 }
  0x33   : > { %p452_p10 = scmp.lt.u32.totalorder %s676_s19, %s781_s1  ;;  %p453_p1 = scmp.lt.u32.totalorder %s451_s3, %s446_s28 }
  0x34   : > { %p449_p5 = pnand %p448_p3, %p447_p0  ;;  %p455_p4 = scmp.lt.u32.totalorder %s446_s28, %s676_s19 }
  0x35   : > { %p454_p2 = por %p453_p1, %p452_p10 }
  0x36   : > { %p450_p7 = pneg %p449_p5 }
  0x37   : > { %p456_p6 = por %p455_p4, %p454_p2 }
  0x39   : > { %p457_p9 = pnand %p456_p6, %p450_p7 }
  0x3b   : > { %460 = shalt.err (!%p457_p9)
}
  0x3c   : > { %s461_s6 = scalar_lea.vmem %s682_s24, 128  ;;  %s549_s14 = smov [#allocation5]  }
  0x3d   : > { %p462_p12 = scmp.ne.s32.totalorder %s682_s24, %s461_s6  ;;  %s466_s18 = sshll.u32 %s549_s14, 4  ;;  %s467_s18 = int_to_ptr.vmem [resolvable:$false] %s466_s18 }
  0x3e   : > { %s468_s21 = scalar_lea.vmem %s467_s18, 256  ;;  %p469_p5 = scmp.lt.s32.totalorder %s682_s24, %s467_s18 }
  0x3f   : > { %p464_p13 = pnand %p462_p12, %p448_p3  ;;  %p470_p10 = scmp.lt.s32.totalorder %s468_s21, %s461_s6 }
  0x41   : > { %p465_p0 = pneg %p464_p13  ;;  %p471_p1 = por %p470_p10, %p469_p5 }
  0x43   : > { %p472_p2 = pnand %p471_p1, %p465_p0 }
  0x45   : > { %475 = shalt.err (!%p472_p2)
}
  0x46   : > { %371 = dma.hbm_to_vmem [thread:$0]  (!%p678_p11), %s676_s19, 128, %s682_s24, %s122_s27  }
  0x47   : > { %p797_p7 = scmp.ne.s32.totalorder %s788_s17, 0 }
  0x48   : > { %p798_p3 = scmp.eq.s32.totalorder (!%p797_p7), %s592_s13, 0 }
  0x49   : > { %141 = sbr.rel (%p797_p7) target bundleno = 463 (0x1cf), region = 28 }
  0x50   : > { %521 = dma.done.wait (%p798_p3), [#allocation3], 128   ;;  %p799_p4 = pmov %p798_p3 }
  0x51   : > { %s716_s22 = sand.u32 1, %s538_s10   ;;  %p800_p11 = scmp.ne.s32.totalorder %s786_s15, 0 }
  0x52   : > { %523 = vsyncadd (%p799_p4), [#allocation3], 4294967168  ;;  %s350_s25 = sshll.u32 %s716_s22, 3  ;;  %s148_s23 = scalar_lea.sflag [#allocation6], %s716_s22 }
  0x53   : > { %s151_s19 = scalar_lea.vmem [#allocation5], %s350_s25 }
  0x54   : > { %525 = dma.done.wait (%p800_p11), %s148_s23, 128  }
  0x55   : > { %527 = vsyncadd (%p800_p11), %s148_s23, 4294967168  ;;  %v172_v0 = vld [vmem:[%s151_s19] sm:$0xff]  ;;  %s550_s17 = smov 1   ;;  %s551_s24 = smov 127   ;;  %v184_v1 = vlaneseq  ;;  %v175_v2 = vld [vmem:[#allocation2 + $0x1] sm:$0x1] }
  0x56   : > { %179 = vrot.lane.b32.xlu0 %v172_v0, %s550_s17  ;;  %v173_v4 = vld [vmem:[#allocation2] sm:$0x1]  ;;  %vm176_vm0 = vcmp.ne.s32.totalorder %v175_v2, 0  ;;  %v552_v6 = vmov 0   ;;  %s553_s15 = smov 2   ;;  %s554_s26 = smov 126  }
  0x57   : > { %v185_v3 = vshrl.u32 %v184_v1, 7  ;;  %vm174_vm1 = vcmp.ne.s32.totalorder %v173_v4, 0  ;;  %v183_v7 = vsel %vm176_vm0, 1, %v552_v6  ;;  %v199_v17 = vld [vmem:[#allocation2 + $0x3] sm:$0x1]  ;;  %s353_s27 = sshll.u32 %s592_s13, 7 }
  0x58   : > { %v190_v8 = vsel %vm174_vm1, 1, %v552_v6  ;;  %v197_v18 = vld [vmem:[#allocation2 + $0x2] sm:$0x1]  ;;  %vm200_vm4 = vcmp.ne.s32.totalorder %v199_v17, 0  ;;  %v223_v29 = vld [vmem:[#allocation2 + $0x5] sm:$0x1]  ;;  %s736_s4 = scalar_lea.hbm %s782_s2, %s353_s27 }
  0x59   : > { %v186_v5 = vsub.s32 0, %v185_v3  ;;  %vm198_vm5 = vcmp.ne.s32.totalorder %v197_v18, 0  ;;  %v207_v19 = vsel %vm200_vm4, 1, %v552_v6  ;;  %v221_v30 = vld [vmem:[#allocation2 + $0x4] sm:$0x1]  ;;  %vm224_vm8 = vcmp.ne.s32.totalorder %v223_v29, 0 }
  0x5a   : > { %177 = vrot.lane.b32.xlu0 %v172_v0, %s551_s24  ;;  %v214_v20 = vsel %vm198_vm5, 1, %v552_v6  ;;  %vm222_vm9 = vcmp.ne.s32.totalorder %v221_v30, 0  ;;  %v231_v31 = vsel %vm224_vm8, 1, %v552_v6  ;;  %s171_s28 = scalar_lea.vmem [#allocation7], %s350_s25  ;;  %s247_s13 = scalar_lea.sflag [#allocation4], %s716_s22 }
  0x5b   : > { %v187_v9 = vrot.slane %v183_v7, %v186_v5  ;;  %v194_v11 = vrot.slane %v190_v8, %v186_v5  ;;  %v211_v21 = vrot.slane %v207_v19, %v186_v5  ;;  %v218_v23 = vrot.slane %v214_v20, %v186_v5  ;;  %s260_s29 = sshll.u32 %s171_s28, 4  ;;  %s555_s6 = smov [#allocation7]   ;;  %s738_s29 = int_to_ptr.vmem [resolvable:$true] %s260_s29 }
  0x5c   : > { %v238_v32 = vsel %vm222_vm9, 1, %v552_v6  ;;  %v235_v33 = vrot.slane %v231_v31, %v186_v5  ;;  %s476_s5 = scalar_lea.vmem %s738_s29, 128  ;;  %s480_s14 = sshll.u32 %s555_s6, 4  ;;  %s481_s14 = int_to_ptr.vmem [resolvable:$false] %s480_s14 }
  0x5d   : > { %vm188_vm2 = vcmp.eq.s32.totalorder %v187_v9, 1  ;;  %vm195_vm3 = vcmp.eq.s32.totalorder %v194_v11, 1  ;;  %vm212_vm6 = vcmp.eq.s32.totalorder %v211_v21, 1  ;;  %vm219_vm7 = vcmp.eq.s32.totalorder %v218_v23, 1  ;;  %p477_p6 = scmp.ne.s32.totalorder %s738_s29, %s476_s5  ;;  %s482_s18 = scalar_lea.vmem %s481_s14, 256 }
  0x5e   : > { %v242_v34 = vrot.slane %v238_v32, %v186_v5  ;;  %vm236_vm10 = vcmp.eq.s32.totalorder %v235_v33, 1  ;;  %p483_p13 = scmp.lt.s32.totalorder %s738_s29, %s481_s14  ;;  %p484_p0 = scmp.lt.s32.totalorder %s482_s18, %s476_s5 }
  0x5f   : > { %p478_p9 = pnand %p477_p6, %p663_p8 }
  0x60   : > { %vm243_vm11 = vcmp.eq.s32.totalorder %v242_v34, 1  ;;  %p485_p5 = por %p484_p0, %p483_p13 }
  0x61   : > { %p479_p12 = pneg %p478_p9 }
  0x63   : > { %p486_p10 = pnand %p485_p5, %p479_p12 }
  0xc8   : > { %v180_v10 = vpop.permute.xlu0 %179 }
  0xc9   : > { %v182_v12 = vmax.f32 %v172_v0, %v180_v10 }
  0xcb   : > { %v189_v15 = vsel %vm188_vm2, %v182_v12, %v172_v0 }
  0xcc   : > { %v178_v13 = vpop.permute.xlu0 %177 }
  0xcd   : > { %v181_v14 = vmin.f32 %v172_v0, %v178_v13 }
  0xcf   : > { %v196_v16 = vsel %vm195_vm3, %v181_v14, %v189_v15 }
  0xd0   : > { %203 = vrot.lane.b32.xlu1 %v196_v16, %s553_s15 }
  0xd4   : > { %201 = vrot.lane.b32.xlu1 %v196_v16, %s554_s26 }
 0x142   : > { %v204_v22 = vpop.permute.xlu1 %203 }
 0x143   : > { %v206_v24 = vmax.f32 %v196_v16, %v204_v22 }
 0x145   : > { %v213_v27 = vsel %vm212_vm6, %v206_v24, %v196_v16 }
 0x146   : > { %v202_v25 = vpop.permute.xlu1 %201 }
 0x147   : > { %v205_v26 = vmin.f32 %v196_v16, %v202_v25 }
 0x149   : > { %v220_v28 = vsel %vm219_vm7, %v205_v26, %v213_v27 }
 0x14a   : > { %225 = vrot.lane.b32.xlu1 %v220_v28, %s551_s24  ;;  %227 = vrot.lane.b32.xlu0 %v220_v28, %s550_s17 }
 0x1bc   : > { %v226_v35 = vpop.permute.xlu1 %225  ;;  %v228_v36 = vpop.permute.xlu0 %227 }
 0x1bd   : > { %v229_v37 = vmin.f32 %v220_v28, %v226_v35  ;;  %v230_v38 = vmax.f32 %v220_v28, %v228_v36 }
 0x1bf   : > { %v237_v39 = vsel %vm236_vm10, %v230_v38, %v220_v28 }
 0x1c0   : > { %v244_v40 = vsel %vm243_vm11, %v229_v37, %v237_v39 }
 0x1c1   : > { %245 = vst [vmem:[%s171_s28] sm:$0xff] %v244_v40 }
 0x1c2   : > { %489 = shalt.err (!%p486_p10)
}
 0x1c3   : > { %s490_s21 = scalar_lea.hbm %s736_s4, 128  ;;  %s494_s23 = scalar_lea.hbm %s782_s2, 256 }
 0x1c4   : > { %p491_p1 = scmp.ne.s32.totalorder %s736_s4, %s490_s21  ;;  %p495_p3 = scmp.lt.u32.totalorder %s736_s4, %s782_s2 }
 0x1c5   : > { %p496_p4 = scmp.lt.u32.totalorder %s494_s23, %s490_s21  ;;  %p498_p6 = scmp.lt.u32.totalorder %s490_s21, %s736_s4 }
 0x1c6   : > { %p492_p2 = pnand %p491_p1, %p663_p8 }
 0x1c7   : > { %p497_p11 = por %p496_p4, %p495_p3 }
 0x1c8   : > { %p493_p7 = pneg %p492_p2 }
 0x1c9   : > { %p499_p9 = por %p498_p6, %p497_p11 }
 0x1cb   : > { %p500_p12 = pnand %p499_p9, %p493_p7 }
 0x1cd   : > { %503 = shalt.err (!%p500_p12)
}
 0x1ce   : > { %362 = dma.vmem_to_hbm [thread:$0]  (%p663_p8), %s738_s29, 128, %s736_s4, %s247_s13  }
 0x1cf PF: > { %s272_s24 = sand.u32 1, %s534_s9   ;;  %p801_p13 = scmp.ne.s32.totalorder %s787_s16, 0 }
 0x1d0   : > { %p802_p0 = scmp.ge.s32.totalorder %s546_s12, 2  ;;  %s273_s15 = scalar_lea.sflag [#allocation4], %s272_s24 }
 0x1d2   : > { %p373_p5 = pnand %p802_p0, %p801_p13 }
 0x1d4   : > { %529 = dma.done.wait (!%p373_p5), %s273_s15, 128  }
 0x1d5   : > { %531 = vsyncadd (!%p373_p5), %s273_s15, 4294967168  ;;  %p16_p10 = scmp.ge.s32.totalorder %s619_s20, 4   ;;  %s803_s9 = smov %s538_s10 }
 0x1d6   : > { %s804_s10 = smov %s542_s11  ;;  %s805_s11 = smov %s655_s7 }
 0x1d7   : > { %s806_s12 = smov %s619_s20  ;;  %18 = sbr.rel (!%p16_p10) target bundleno = 6 (0x6), region = 78 }
 0x1de   :  { %278 = vsyncpa [#allocation3], 1 }
 0x1df   :  { %280 = vsyncpa [#allocation3 + $0x1], 1 }
 0x1e0   :  { %281 = vsyncpa [#allocation6], 1 }
 0x1e1   :  { %283 = vsyncpa [#allocation6 + $0x1], 1 }
 0x1e2   :  { %284 = vsyncpa [#allocation4], 1 }
 0x1e3   :  { %286 = vsyncpa [#allocation4 + $0x1], 1 }

</bundles_post_ra>
